<compile_context>
chip_gen: v5e
topology: v5e:2x2
jax: 0.10.0
libtpu: 0.0.40
codegen_flags: <defaults>
</compile_context>

<pallas_src>
import jax
import jax.numpy as jnp
from jax import lax
from jax.experimental import pallas as pl
from jax.experimental.pallas import tpu as pltpu

KH = KW = 7
STRIDE = 2
PAD = 3
EPS = 1e-5


# ----------------------------- Pallas kernel ------------------------------- #
def _fused_kernel(p_ref, w1_ref, s1_ref, b1_ref, s2_ref, b2_ref, w2_ref, o_ref):
    # 7x7/s2 conv as W1 @ patches (bf16 MXU, f32 accum), two folded BN+ReLU
    # stages (VPU, per-sublane scale/shift broadcast along lanes), and the
    # 1x1 projection conv as a second (tiny-K, f32) matmul.
    h = jnp.dot(w1_ref[...], p_ref[...], preferred_element_type=jnp.float32)
    h = jnp.maximum(h * s1_ref[...] + b1_ref[...], 0.0)   # per-branch BN + ReLU
    h = jnp.maximum(h * s2_ref[...] + b2_ref[...], 0.0)   # post-concat BN + ReLU
    o_ref[...] = jnp.dot(w2_ref[...], h, preferred_element_type=jnp.float32)


# ------------------------------- JAX glue ----------------------------------- #
def _im2col_t(x_nhwc, kh, kw, stride, pad):
    """Transposed im2col: returns (K, M) with K=(kh*KW+kw)*Cin+c, M=n*Ho*Wo+ho*Wo+wo."""
    n, h, w, c = x_nhwc.shape
    ho = (h + 2 * pad - kh) // stride + 1
    wo = (w + 2 * pad - kw) // stride + 1
    xp = jnp.pad(x_nhwc, ((0, 0), (pad, pad), (pad, pad), (0, 0)))
    cols = []
    for i in range(kh):
        for j in range(kw):
            sl = xp[:, i:i + stride * ho:stride, j:j + stride * wo:stride, :]  # (N,Ho,Wo,C)
            cols.append(jnp.transpose(sl, (3, 0, 1, 2)))                       # (C,N,Ho,Wo)
    pat = jnp.stack(cols, axis=0)                                              # (KH*KW,C,N,Ho,Wo)
    return pat.reshape(kh * kw * c, n * ho * wo), ho, wo


def _pick_tiling(m, tile_m):
    """Tile the lane (pixel) axis: multiple of 128, padded M, prefer even grid."""
    tile = max(128, (int(tile_m) // 128) * 128)
    m128 = ((m + 127) // 128) * 128
    tile = min(tile, m128)
    m_pad = ((m + tile - 1) // tile) * tile
    grid = m_pad // tile
    # v7x has 2 TensorCores sharding the "parallel" grid axis: prefer an even grid.
    if grid > 1 and grid % 2 == 1 and tile >= 256:
        tile //= 2
        grid = m_pad // tile
    return tile, m_pad, grid


def modified_conv_alt(x_nchw, w1_t, s1, b1, s2, b2, w2_t, *, tile_m=512):
    """x_nchw: (N, 4, H, W) float32. Returns (N, Cout, Hout, Wout) float32.

    w1_t : (Ctot, KH*KW*4) fused 7x7 conv weight (transposed matmul form)
    s1,b1: (Ctot,) folded per-branch BN scale/shift
    s2,b2: (Ctot,) folded post-concat BN scale/shift
    w2_t : (Cout, Ctot) 1x1 projection weight
    """
    n = x_nchw.shape[0]
    x_nhwc = jnp.transpose(x_nchw, (0, 2, 3, 1)).astype(jnp.float32)
    patches_t, ho, wo = _im2col_t(x_nhwc, KH, KW, STRIDE, PAD)   # (kdim, M) f32
    kdim, m = patches_t.shape
    ctot = w1_t.shape[0]
    cout = w2_t.shape[0]

    tile, m_pad, grid = _pick_tiling(m, tile_m)
    if m_pad != m:
        patches_t = jnp.pad(patches_t, ((0, 0), (0, m_pad - m)))

    # bf16 for the dominant HBM streams / MXU-native path; f32 accumulation.
    patches_t = patches_t.astype(jnp.bfloat16)
    w1_bf = w1_t.astype(jnp.bfloat16)
    w2_f32 = w2_t.astype(jnp.float32)

    # BN params as (Ctot, 1): per-sublane scale/shift broadcast along lanes.
    s1r = s1.reshape(ctot, 1).astype(jnp.float32)
    b1r = b1.reshape(ctot, 1).astype(jnp.float32)
    s2r = s2.reshape(ctot, 1).astype(jnp.float32)
    b2r = b2.reshape(ctot, 1).astype(jnp.float32)

    out_t = pl.pallas_call(
        _fused_kernel,
        out_shape=jax.ShapeDtypeStruct((cout, m_pad), jnp.float32),
        grid_spec=pltpu.PrefetchScalarGridSpec(
            num_scalar_prefetch=0,
            grid=(grid,),
            in_specs=[
                pl.BlockSpec((kdim, tile), lambda i: (0, i)),   # patches tile (lane-dense)
                pl.BlockSpec((ctot, kdim), lambda i: (0, 0)),   # fused 7x7 weight
                pl.BlockSpec((ctot, 1), lambda i: (0, 0)),      # branch BN scale
                pl.BlockSpec((ctot, 1), lambda i: (0, 0)),      # branch BN shift
                pl.BlockSpec((ctot, 1), lambda i: (0, 0)),      # concat BN scale
                pl.BlockSpec((ctot, 1), lambda i: (0, 0)),      # concat BN shift
                pl.BlockSpec((cout, ctot), lambda i: (0, 0)),   # 1x1 proj weight
            ],
            out_specs=pl.BlockSpec((cout, tile), lambda i: (0, i)),
        ),
        compiler_params=pltpu.CompilerParams(
            dimension_semantics=("parallel",)),
    )(patches_t, w1_bf, s1r, b1r, s2r, b2r, w2_f32)

    out_t = out_t[:, :m]                                   # drop M padding
    out = out_t.reshape(cout, n, ho, wo)
    return jnp.transpose(out, (1, 0, 2, 3))                # back to NCHW


# --------------------------- parameter construction ------------------------- #
def _fold_bn(gamma, beta, mean, var, eps=EPS):
    scale = gamma / jnp.sqrt(var + eps)
    shift = beta - mean * scale
    return scale, shift


def build_params(key, c1, c2, cout):
    ks = jax.random.split(key, 16)
    # original conv (ResNet-stem style, bias=False): (C1, 3, 7, 7)
    w_orig = 0.1 * jax.random.normal(ks[0], (c1, 3, KH, KW), jnp.float32)
    # new conv (bias=False): (C2, 1, 7, 7)
    w_new = 0.1 * jax.random.normal(ks[1], (c2, 1, KH, KW), jnp.float32)
    # BatchNorm params (inference mode: running stats)
    g1 = jax.random.uniform(ks[2], (c1,), minval=0.5, maxval=1.5)
    b1 = 0.1 * jax.random.normal(ks[3], (c1,))
    m1 = 0.1 * jax.random.normal(ks[4], (c1,))
    v1 = jax.random.uniform(ks[5], (c1,), minval=0.5, maxval=1.5)
    g2 = jax.random.uniform(ks[6], (c2,), minval=0.5, maxval=1.5)
    b2 = 0.1 * jax.random.normal(ks[7], (c2,))
    m2 = 0.1 * jax.random.normal(ks[8], (c2,))
    v2 = jax.random.uniform(ks[9], (c2,), minval=0.5, maxval=1.5)
    ctot = c1 + c2
    g3 = jax.random.uniform(ks[10], (ctot,), minval=0.5, maxval=1.5)
    b3 = 0.1 * jax.random.normal(ks[11], (ctot,))
    m3 = 0.1 * jax.random.normal(ks[12], (ctot,))
    v3 = jax.random.uniform(ks[13], (ctot,), minval=0.5, maxval=1.5)
    # 1x1 projection conv weight: (Cout, Ctot, 1, 1)
    w_proj = 0.1 * jax.random.normal(ks[14], (cout, ctot, 1, 1), jnp.float32)

    # Fuse the two 7x7 convs (disjoint input-channel slices, no bias) into one.
    w_comb = jnp.zeros((ctot, 4, KH, KW), jnp.float32)
    w_comb = w_comb.at[:c1, :3].set(w_orig)
    w_comb = w_comb.at[c1:, 3:4].set(w_new)
    # transposed matmul form matching im2col ordering k = (kh*KW + kw)*Cin + c
    w1_t = jnp.transpose(w_comb, (0, 2, 3, 1)).reshape(ctot, KH * KW * 4)

    sa1, sha1 = _fold_bn(g1, b1, m1, v1)
    sa2, sha2 = _fold_bn(g2, b2, m2, v2)
    s_branch = jnp.concatenate([sa1, sa2])
    sh_branch = jnp.concatenate([sha1, sha2])
    s_cat, sh_cat = _fold_bn(g3, b3, m3, v3)

    w2_t = w_proj[:, :, 0, 0]                               # (Cout, Ctot)

    raw = dict(w_orig=w_orig, w_new=w_new, w_proj=w_proj)
    fused = dict(w1_t=w1_t, s1=s_branch, b1=sh_branch,
                 s2=s_cat, b2=sh_cat, w2_t=w2_t)
    return raw, fused


# ------------------------------ pure-JAX reference --------------------------- #
def reference(x_nchw, raw, fused):
    dn = ('NCHW', 'OIHW', 'NCHW')
    x3, x1 = x_nchw[:, :3], x_nchw[:, 3:4]
    y1 = lax.conv_general_dilated(x3, raw['w_orig'], (STRIDE, STRIDE),
                                  ((PAD, PAD), (PAD, PAD)), dimension_numbers=dn)
    y2 = lax.conv_general_dilated(x1, raw['w_new'], (STRIDE, STRIDE),
                                  ((PAD, PAD), (PAD, PAD)), dimension_numbers=dn)
    y = jnp.concatenate([y1, y2], axis=1)
    s1 = fused['s1'][None, :, None, None]
    b1 = fused['b1'][None, :, None, None]
    s2 = fused['s2'][None, :, None, None]
    b2 = fused['b2'][None, :, None, None]
    y = jnp.maximum(y * s1 + b1, 0.0)        # per-branch BN + ReLU (channel-wise, so after concat == before)
    y = jnp.maximum(y * s2 + b2, 0.0)        # post-concat BN + ReLU
    return lax.conv_general_dilated(y, raw['w_proj'], (1, 1), 'VALID',
                                    dimension_numbers=dn)


if __name__ == "__main__":
    # Small shapes: batch=2, in-channels=4 (3+1 split), spatial=16x16.
    # conv.out_channels = 16, new_conv_out_channels = 16, out_channels = 16.
    N, H, W = 2, 16, 16
    C1, C2, COUT = 16, 16, 16

    key = jax.random.PRNGKey(0)
    kx, kp = jax.random.split(key)
    x = jax.random.normal(kx, (N, 4, H, W), jnp.float32)
    raw, fused = build_params(kp, C1, C2, COUT)

    out = modified_conv_alt(x, fused['w1_t'], fused['s1'], fused['b1'],
                            fused['s2'], fused['b2'], fused['w2_t'])
    out = jax.block_until_ready(out)

    ref = jax.block_until_ready(reference(x, raw, fused))
    assert out.shape == ref.shape == (N, COUT, H // 2, W // 2), (out.shape, ref.shape)
    # bf16 patch/weight streams with f32 accumulation -> slightly looser tolerance
    # than the pure-f32 reference (196-deep reduction), as anticipated in review.
    assert jnp.allclose(out, ref, rtol=3e-2, atol=3e-2), float(jnp.max(jnp.abs(out - ref)))

    print("KERNEL_OK")
</pallas_src>

<mosaic_0001>
module attributes {stable_mosaic.version = 11 : i64} {
  func.func @_fused_kernel(%arg0: i32, %arg1: memref<196x128xbf16, #tpu.memory_space<vmem>>, %arg2: memref<32x196xbf16, #tpu.memory_space<vmem>>, %arg3: memref<32x1xf32, #tpu.memory_space<vmem>>, %arg4: memref<32x1xf32, #tpu.memory_space<vmem>>, %arg5: memref<32x1xf32, #tpu.memory_space<vmem>>, %arg6: memref<32x1xf32, #tpu.memory_space<vmem>>, %arg7: memref<16x32xf32, #tpu.memory_space<vmem>>, %arg8: memref<16x128xf32, #tpu.memory_space<vmem>>) attributes {dimension_semantics = [#tpu.dimension_semantics<parallel>], iteration_bounds = array<i64: 1>, scalar_prefetch = 0 : i64, scratch_operands = 0 : i64, tpu.core_type = #tpu.core_type<tc>, window_params = [{transform_indices = @transform_0, window_bounds = array<i64: 196, 128>}, {pipeline_mode = #tpu.pipeline_mode<synchronous>, transform_indices = @transform_1, window_bounds = array<i64: 32, 196>}, {pipeline_mode = #tpu.pipeline_mode<synchronous>, transform_indices = @transform_2, window_bounds = array<i64: 32, 1>}, {pipeline_mode = #tpu.pipeline_mode<synchronous>, transform_indices = @transform_3, window_bounds = array<i64: 32, 1>}, {pipeline_mode = #tpu.pipeline_mode<synchronous>, transform_indices = @transform_4, window_bounds = array<i64: 32, 1>}, {pipeline_mode = #tpu.pipeline_mode<synchronous>, transform_indices = @transform_5, window_bounds = array<i64: 32, 1>}, {pipeline_mode = #tpu.pipeline_mode<synchronous>, transform_indices = @transform_6, window_bounds = array<i64: 16, 32>}, {transform_indices = @transform_7, window_bounds = array<i64: 16, 128>}]} {
    %c0 = arith.constant 0 : index
    %c0_0 = arith.constant 0 : index
    %0 = vector.load %arg2[%c0, %c0_0] : memref<32x196xbf16, #tpu.memory_space<vmem>>, vector<32x196xbf16>
    %c0_1 = arith.constant 0 : index
    %c0_2 = arith.constant 0 : index
    %1 = vector.load %arg1[%c0_1, %c0_2] : memref<196x128xbf16, #tpu.memory_space<vmem>>, vector<196x128xbf16>
    %cst = arith.constant dense<0.000000e+00> : vector<32x128xf32>
    %2 = tpu.matmul %0, %1, %cst {dimension_numbers = #tpu.dot_dimension_numbers<[1], [0], [0], [1], [0, 0, 1, 1], [], []>} : vector<32x196xbf16>, vector<196x128xbf16>, vector<32x128xf32> -> vector<32x128xf32>
    %c0_3 = arith.constant 0 : index
    %c0_4 = arith.constant 0 : index
    %3 = vector.load %arg3[%c0_3, %c0_4] : memref<32x1xf32, #tpu.memory_space<vmem>>, vector<32x1xf32>
    %4 = vector.broadcast %3 : vector<32x1xf32> to vector<32x128xf32>
    %5 = arith.mulf %2, %4 : vector<32x128xf32>
    %c0_5 = arith.constant 0 : index
    %c0_6 = arith.constant 0 : index
    %6 = vector.load %arg4[%c0_5, %c0_6] : memref<32x1xf32, #tpu.memory_space<vmem>>, vector<32x1xf32>
    %7 = vector.broadcast %6 : vector<32x1xf32> to vector<32x128xf32>
    %8 = arith.addf %5, %7 : vector<32x128xf32>
    %cst_7 = arith.constant 0.000000e+00 : f32
    %9 = vector.broadcast %cst_7 : f32 to vector<32x128xf32>
    %10 = arith.maximumf %8, %9 : vector<32x128xf32>
    %c0_8 = arith.constant 0 : index
    %c0_9 = arith.constant 0 : index
    %11 = vector.load %arg5[%c0_8, %c0_9] : memref<32x1xf32, #tpu.memory_space<vmem>>, vector<32x1xf32>
    %12 = vector.broadcast %11 : vector<32x1xf32> to vector<32x128xf32>
    %13 = arith.mulf %10, %12 : vector<32x128xf32>
    %c0_10 = arith.constant 0 : index
    %c0_11 = arith.constant 0 : index
    %14 = vector.load %arg6[%c0_10, %c0_11] : memref<32x1xf32, #tpu.memory_space<vmem>>, vector<32x1xf32>
    %15 = vector.broadcast %14 : vector<32x1xf32> to vector<32x128xf32>
    %16 = arith.addf %13, %15 : vector<32x128xf32>
    %cst_12 = arith.constant 0.000000e+00 : f32
    %17 = vector.broadcast %cst_12 : f32 to vector<32x128xf32>
    %18 = arith.maximumf %16, %17 : vector<32x128xf32>
    %c0_13 = arith.constant 0 : index
    %c0_14 = arith.constant 0 : index
    %19 = vector.load %arg7[%c0_13, %c0_14] : memref<16x32xf32, #tpu.memory_space<vmem>>, vector<16x32xf32>
    %cst_15 = arith.constant dense<0.000000e+00> : vector<16x128xf32>
    %20 = tpu.matmul %19, %18, %cst_15 {dimension_numbers = #tpu.dot_dimension_numbers<[1], [0], [0], [1], [0, 0, 1, 1], [], []>} : vector<16x32xf32>, vector<32x128xf32>, vector<16x128xf32> -> vector<16x128xf32>
    %c0_16 = arith.constant 0 : index
    %c0_17 = arith.constant 0 : index
    %21 = vector.load %arg8[%c0_16, %c0_17] : memref<16x128xf32, #tpu.memory_space<vmem>>, vector<16x128xf32>
    tpu.vector_store %arg8[%c0_16, %c0_17], %20 {strides = array<i32>} : memref<16x128xf32, #tpu.memory_space<vmem>>, vector<16x128xf32>,
    return
  }
  func.func @transform_0(%arg0: i32) -> (i32, i32) {
    %c0_i32 = arith.constant 0 : i32
    %c0_i32_0 = arith.constant 0 : i32
    return %c0_i32, %arg0 : i32, i32
  }
  func.func @transform_1(%arg0: i32) -> (i32, i32) {
    %c0_i32 = arith.constant 0 : i32
    %c0_i32_0 = arith.constant 0 : i32
    %c0_i32_1 = arith.constant 0 : i32
    return %c0_i32, %c0_i32_0 : i32, i32
  }
  func.func @transform_2(%arg0: i32) -> (i32, i32) {
    %c0_i32 = arith.constant 0 : i32
    %c0_i32_0 = arith.constant 0 : i32
    %c0_i32_1 = arith.constant 0 : i32
    return %c0_i32, %c0_i32_0 : i32, i32
  }
  func.func @transform_3(%arg0: i32) -> (i32, i32) {
    %c0_i32 = arith.constant 0 : i32
    %c0_i32_0 = arith.constant 0 : i32
    %c0_i32_1 = arith.constant 0 : i32
    return %c0_i32, %c0_i32_0 : i32, i32
  }
  func.func @transform_4(%arg0: i32) -> (i32, i32) {
    %c0_i32 = arith.constant 0 : i32
    %c0_i32_0 = arith.constant 0 : i32
    %c0_i32_1 = arith.constant 0 : i32
    return %c0_i32, %c0_i32_0 : i32, i32
  }
  func.func @transform_5(%arg0: i32) -> (i32, i32) {
    %c0_i32 = arith.constant 0 : i32
    %c0_i32_0 = arith.constant 0 : i32
    %c0_i32_1 = arith.constant 0 : i32
    return %c0_i32, %c0_i32_0 : i32, i32
  }
  func.func @transform_6(%arg0: i32) -> (i32, i32) {
    %c0_i32 = arith.constant 0 : i32
    %c0_i32_0 = arith.constant 0 : i32
    %c0_i32_1 = arith.constant 0 : i32
    return %c0_i32, %c0_i32_0 : i32, i32
  }
  func.func @transform_7(%arg0: i32) -> (i32, i32) {
    %c0_i32 = arith.constant 0 : i32
    %c0_i32_0 = arith.constant 0 : i32
    return %c0_i32, %arg0 : i32, i32
  }
}

</mosaic_0001>

<bundles_post_ra>
// kernel: tpu_custom_call.1
= control target key start
LH: loop header
LB: loop body
LE: loop exit
PB: predicated region body
PF: predicated region fallthrough
CT: control target
= control target key end

     0   :  { %12 = vsyncpa [#allocation3], 0  ;;  %s675_s0 = inlined_call_operand.hbm [shape: bf16[196,128], index: 0, kind: input, shape index: {}]   ;;  %s676_s1 = inlined_call_operand.vmem [shape: bf16[32,196], index: 1, kind: input, shape index: {}]   ;;  %s677_s2 = inlined_call_operand.vmem [shape: f32[32,1], index: 2, kind: input, shape index: {}]   ;;  %s678_s3 = inlined_call_operand.vmem [shape: f32[32,1], index: 3, kind: input, shape index: {}]   ;;  %s679_s4 = inlined_call_operand.vmem [shape: f32[32,1], index: 4, kind: input, shape index: {}]   ;;  %s680_s5 = inlined_call_operand.vmem [shape: f32[32,1], index: 5, kind: input, shape index: {}]   ;;  %s681_s6 = inlined_call_operand.vmem [shape: f32[16,32], index: 6, kind: input, shape index: {}]   ;;  %s682_s7 = inlined_call_operand.hbm [shape: f32[16,128], index: 7, kind: output, shape index: {}]  }
   0x1   :  { %13 = vsyncpa [#allocation4], 0  ;;  %s18_s26 = sshll.u32 %s675_s0, 4  ;;  %s542_s27 = smov [#allocation2]   ;;  %s19_s26 = int_to_ptr.hbm [resolvable:$true] %s18_s26 }
   0x2   :  { %s20_s28 = sshll.u32 %s542_s27, 4  ;;  %s543_s29 = smov 64   ;;  %s21_s28 = int_to_ptr.vmem [resolvable:$true] %s20_s28 }
   0x3   :  { %s544_s30 = smov 4  }
   0x4   :  { %26 = dma.hbm_to_vmem [thread:$0]  %s19_s26, 1600, %s21_s28, [#allocation3], %s543_s29, %s543_s29, %s544_s30  }
   0x5   :  { %538 = dma.done.wait [#allocation3], 1600  }
   0x6   :  { %539 = vsyncadd [#allocation3], 4294965696  ;;  %v545_v0 = vmov 0   ;;  %v218_v1 = vld [vmem:[%s677_s2 + $0x18] sm:$0xff]  ;;  %v72_v3 = vld [vmem:[#allocation2 + $0x60] sm:$0x3] }
   0x7   :  { %487 = vset.pattern.permute.xlu0 %v545_v0  ;;  %488 = vset.pattern.permute.xlu1 %v545_v0  ;;  %v467_v2 = vld [vmem:[#allocation2 + $0x38] sm:$0xff]  ;;  %v140_v4 = vunpack.c.l.b16 %v72_v3  ;;  %vm173_vm0 = vcmask 1041408   ;;  %v466_v6 = vld [vmem:[#allocation2 + $0x30] sm:$0xff]  ;;  %v465_v11 = vld [vmem:[#allocation2 + $0x28] sm:$0xff]  ;;  %vm166_vm1 = vcmask 556032   ;;  %vm337_vm2 = vcmask 261120  }
   0x8   :  { %489 = vset.pattern.permute.xlu2 %v545_v0  ;;  %236 = vperm.xlu0 %487, %v218_v1   ;;  %v246_v5 = vld [vmem:[%s678_s3 + $0x18] sm:$0xff]  ;;  %v217_v9 = vld [vmem:[%s677_s2 + $0x10] sm:$0xff]  ;;  %v216_v13 = vld [vmem:[%s677_s2 + $0x8] sm:$0xff]  ;;  %s546_s29 = smov [#allocation5]   ;;  %s375_s9 = sshll.u32 %s682_s7, 4  ;;  %s376_s9 = int_to_ptr.hbm [resolvable:$true] %s375_s9 }
   0x9   :  { %177 = vmatpush.bf16.msra.mxu0 %v467_v2  ;;  %472 = vmatpush.bf16.msra.mxu3 %v467_v2  ;;  %v153_v7 = vpack.c.b16 %v140_v4, %v140_v4  ;;  %v471_v10 = vld [vmem:[#allocation2 + $0x58] sm:$0xff]  ;;  %v245_v12 = vld [vmem:[%s678_s3 + $0x10] sm:$0xff]  ;;  %v464_v15 = vld [vmem:[#allocation2 + $0x20] sm:$0xff]  ;;  %s373_s30 = sshll.u32 %s546_s29, 4  ;;  %s547_s0 = smov 128   ;;  %s374_s30 = int_to_ptr.vmem [resolvable:$true] %s373_s30 }
   0xa   :  { %264 = vperm.xlu1 %488, %v246_v5   ;;  %259 = vperm.xlu2 %489, %v245_v12   ;;  %v470_v14 = vld [vmem:[#allocation2 + $0x50] sm:$0xff]  ;;  %v215_v16 = vld [vmem:[%s677_s2] sm:$0xff]  ;;  %v244_v17 = vld [vmem:[%s678_s3 + $0x8] sm:$0xff]  ;;  %s548_s10 = smov 8  }
   0xb   :  { %v175_v8 = vsel %vm173_vm0, %v153_v7, 0  ;;  %v469_v18 = vld [vmem:[#allocation2 + $0x48] sm:$0xff]  ;;  %v463_v19 = vld [vmem:[#allocation2 + $0x18] sm:$0xff]  ;;  %v468_v21 = vld [vmem:[#allocation2 + $0x40] sm:$0xff] }
   0xc   :  { %199 = vmatpush.bf16.msra.mxu1 %v175_v8  ;;  %v278_v20 = vld [vmem:[%s679_s4 + $0x18] sm:$0xff]  ;;  %v462_v22 = vld [vmem:[#allocation2 + $0x10] sm:$0xff]  ;;  %v456_v23 = vld [vmem:[%s676_s1 + $0x4] sm:$0xf] }
   0xd   :  { %178 = vmatpush.bf16.msra.mxu0 %v466_v6  ;;  %473 = vmatpush.bf16.msra.mxu3 %v466_v6  ;;  %v392_v24 = vld [vmem:[%s676_s1 + $0x8] sm:$0xf0]  ;;  %v243_v26 = vld [vmem:[%s678_s3] sm:$0xff]  ;;  %v277_v27 = vld [vmem:[%s679_s4 + $0x10] sm:$0xff] }
   0xe   :  { %v395_v25 = vor.u32 %v456_v23, %v392_v24  ;;  %v461_v28 = vld [vmem:[#allocation2 + $0x8] sm:$0xff]  ;;  %v306_v29 = vld [vmem:[%s680_s5 + $0x18] sm:$0xff]  ;;  %v460_v30 = vld [vmem:[#allocation2] sm:$0xff] }
   0xf   :  { %v390_v31 = vld [vmem:[%s676_s1] sm:$0xf]  ;;  %v457_v32 = vld [vmem:[%s676_s1 + $0x4] sm:$0xf0]  ;;  %v398_v33 = vld [vmem:[%s676_s1 + $0x10] sm:$0xf] }
  0x10   :  { %231 = vperm.xlu0 %487, %v217_v9   ;;  %200 = vmatpush.bf16.msra.mxu1 %v471_v10  ;;  %v459_v34 = vld [vmem:[%s676_s1 + $0x14] sm:$0xf0]  ;;  %v391_v35 = vor.u32 %v457_v32, %v390_v31  ;;  %v276_v36 = vld [vmem:[%s679_s4 + $0x8] sm:$0xff]  ;;  %v305_v37 = vld [vmem:[%s680_s5 + $0x10] sm:$0xff] }
  0x11   :  { %179 = vmatpush.bf16.msra.mxu0 %v465_v11  ;;  %474 = vmatpush.bf16.msra.mxu3 %v465_v11  ;;  %v399_v38 = vor.u32 %v459_v34, %v398_v33  ;;  %v275_v39 = vld [vmem:[%s679_s4] sm:$0xff]  ;;  %v458_v40 = vld [vmem:[%s676_s1 + $0x14] sm:$0xf]  ;;  %v400_v41 = vld [vmem:[%s676_s1 + $0x18] sm:$0xf0] }
  0x12   :  { %226 = vperm.xlu1 %488, %v216_v13   ;;  %221 = vperm.xlu2 %489, %v215_v16   ;;  %v403_v42 = vor.u32 %v458_v40, %v400_v41  ;;  %v304_v43 = vld [vmem:[%s680_s5 + $0x8] sm:$0xff]  ;;  %v303_v44 = vld [vmem:[%s680_s5] sm:$0xff] }
  0x13   :  { %v335_v33 = vld [vmem:[%s681_s6] sm:$0xff]  ;;  %v336_v34 = vld [vmem:[%s681_s6 + $0x8] sm:$0xff] }
  0x14   :  { %201 = vmatpush.bf16.msra.mxu1 %v470_v14 }
  0x15   :  { %180 = vmatpush.bf16.msra.mxu0 %v464_v15  ;;  %475 = vmatpush.bf16.msra.mxu3 %v464_v15 }
  0x18   :  { %254 = vperm.xlu0 %487, %v244_v17   ;;  %202 = vmatpush.bf16.msra.mxu1 %v469_v18 }
  0x19   :  { %181 = vmatpush.bf16.msra.mxu0 %v463_v19  ;;  %476 = vmatpush.bf16.msra.mxu3 %v463_v19 }
  0x1a   :  { %296 = vperm.xlu1 %488, %v278_v20   ;;  %249 = vperm.xlu2 %489, %v243_v26  }
  0x1c   :  { %203 = vmatpush.bf16.msra.mxu1 %v468_v21 }
  0x1d   :  { %182 = vmatpush.bf16.msra.mxu0 %v462_v22  ;;  %477 = vmatpush.bf16.msra.mxu3 %v462_v22 }
  0x1f   :  { %452 = vmatmul.msk.bf16.vlgmr.msra.gmra.mxu1 %vm166_vm1, %v395_v25 }
  0x20   :  { %291 = vperm.xlu0 %487, %v277_v27  }
  0x21   :  { %183 = vmatpush.bf16.msra.mxu0 %v461_v28  ;;  %478 = vmatpush.bf16.msra.mxu3 %v461_v28 }
  0x22   :  { %324 = vperm.xlu1 %488, %v306_v29   ;;  %286 = vperm.xlu2 %489, %v276_v36  }
  0x25   :  { %184 = vmatpush.bf16.msra.mxu0 %v460_v30  ;;  %479 = vmatpush.bf16.msra.mxu3 %v460_v30 }
  0x28   :  { %319 = vperm.xlu0 %487, %v305_v37   ;;  %185 = vmatmul.bf16.vlgmr.msra.gmra.mxu0 %v391_v35 }
  0x29   :  { %190 = vmatmul.bf16.vlgmr.msra.gmra.mxu3 %v399_v38 }
  0x2a   :  { %281 = vperm.xlu1 %488, %v275_v39   ;;  %314 = vperm.xlu2 %489, %v304_v43  }
  0x2f   :  { %453 = vmatmul.msk.bf16.gmra.mxu1 %vm166_vm1, %v403_v42 }
  0x30   :  { %309 = vperm.xlu0 %487, %v303_v44  }
  0x64   :  { %v260_v47 = vpop.permute.xlu2 %259 }
  0x6c   :  { %v222_v51 = vpop.permute.xlu2 %221 }
  0x74   :  { %v250_v56 = vpop.permute.xlu2 %249 }
  0x7a   :  { %v237_v45 = vpop.permute.xlu0 %236 }
  0x7c   :  { %v265_v46 = vpop.permute.xlu1 %264  ;;  %v287_v9 = vpop.permute.xlu2 %286 }
  0x82   :  { %v232_v48 = vpop.permute.xlu0 %231 }
  0x84   :  { %v227_v50 = vpop.permute.xlu1 %226  ;;  %v315_v25 = vpop.permute.xlu2 %314 }
  0x8a   :  { %v255_v52 = vpop.permute.xlu0 %254 }
  0x8c   :  { %v297_v55 = vpop.permute.xlu1 %296 }
  0x92   :  { %v292_v62 = vpop.permute.xlu0 %291 }
  0x94   :  { %v325_v2 = vpop.permute.xlu1 %324 }
  0x9a   :  { %v320_v13 = vpop.permute.xlu0 %319 }
  0x9c   :  { %v205_v49 = vpop.f32.mrf.mxu1  ;;  %v282_v21 = vpop.permute.xlu1 %281 }
  0xa2   :  { %v310_v28 = vpop.permute.xlu0 %309 }
  0xa4   :  { %v207_v53 = vpop.f32.mrf.mxu1 }
  0xa5   :  { %v186_v54 = vpop.f32.mrf.mxu0 }
  0xa6   :  { %v206_v63 = vadd.f32 %v205_v49, %v186_v54 }
  0xa8   :  { %v239_v3 = vmul.f32 %v222_v51, %v206_v63 }
  0xaa   :  { %v267_v10 = vadd.f32 %v250_v56, %v239_v3 }
  0xac   :  { %v191_v57 = vpop.f32.mrf.mxu3  ;;  %v210_v58 = vpop.f32.mrf.mxu1  ;;  %v271_v16 = vmax.f32 %v267_v10, 0.0 }
  0xad   :  { %v188_v59 = vpop.f32.mrf.mxu0  ;;  %v211_v60 = vadd.f32 %v210_v58, %v191_v57 }
  0xae   :  { %v208_v61 = vadd.f32 %v207_v53, %v188_v59  ;;  %v299_v24 = vmul.f32 %v282_v21, %v271_v16 }
  0xaf   :  { %v241_v0 = vmul.f32 %v232_v48, %v211_v60 }
  0xb0   :  { %v240_v1 = vmul.f32 %v227_v50, %v208_v61  ;;  %v327_v30 = vadd.f32 %v310_v28, %v299_v24 }
  0xb1   :  { %v269_v4 = vadd.f32 %v260_v47, %v241_v0 }
  0xb2   :  { %v268_v7 = vadd.f32 %v255_v52, %v240_v1  ;;  %v331_v32 = vmax.f32 %v327_v30, 0.0 }
  0xb3   :  { %v273_v11 = vmax.f32 %v269_v4, 0.0 }
  0xb4   :  { %v193_v5 = vpop.f32.mrf.mxu3  ;;  %v212_v6 = vpop.f32.mrf.mxu1  ;;  %v272_v14 = vmax.f32 %v268_v7, 0.0 }
  0xb5   :  { %v213_v8 = vadd.f32 %v212_v6, %v193_v5  ;;  %v301_v18 = vmul.f32 %v292_v62, %v273_v11 }
  0xb6   :  { %v300_v20 = vmul.f32 %v287_v9, %v272_v14 }
  0xb7   :  { %v242_v12 = vmul.f32 %v237_v45, %v213_v8  ;;  %v329_v23 = vadd.f32 %v320_v13, %v301_v18 }
  0xb8   :  { %v328_v27 = vadd.f32 %v315_v25, %v300_v20 }
  0xb9   :  { %v270_v15 = vadd.f32 %v265_v46, %v242_v12  ;;  %v333_v29 = vmax.f32 %v329_v23, 0.0 }
  0xba   :  { %v332_v31 = vmax.f32 %v328_v27, 0.0 }
  0xbb   :  { %v274_v17 = vmax.f32 %v270_v15, 0.0 }
  0xbd   :  { %v302_v19 = vmul.f32 %v297_v55, %v274_v17 }
  0xbf   :  { %v330_v22 = vadd.f32 %v325_v2, %v302_v19 }
  0xc1   :  { %v334_v26 = vmax.f32 %v330_v22, 0.0 }
  0xc3   :  { %356 = vmatpush.msra.mxu2 %v334_v26 }
  0xc5   :  { %357 = vmatpush.msra.mxu2 %v333_v29 }
  0xc7   :  { %358 = vmatpush.msra.mxu2 %v332_v31 }
  0xc9   :  { %359 = vmatpush.msra.mxu2 %v331_v32 }
  0xca   :  { %454 = vmatmul.msk.f32.vlgmr.msra.gmra.mxu2 %vm337_vm2, %v335_v33 }
  0xd2   :  { %455 = vmatmul.msk.f32.gmra.mxu2 %vm337_vm2, %v336_v34 }
 0x14d   :  { %v361_v35 = vpop.f32.mrf.mxu2 }
 0x14e   :  { %367 = vst [vmem:[#allocation5] sm:$0xff] %v361_v35 }
 0x155   :  { %v364_v36 = vpop.f32.mrf.mxu2 }
 0x156   :  { %368 = vst [vmem:[#allocation5 + $0x8] sm:$0xff] %v364_v36 }
 0x157   :  { %381 = dma.vmem_to_hbm [thread:$0]  %s374_s30, 256, %s376_s9, [#allocation4], %s547_s0, %s547_s0, %s548_s10  }
 0x158   :  { %540 = dma.done.wait [#allocation4], 256  }
 0x159   :  { %541 = vsyncadd [#allocation4], 4294967040 }
 0x15a   :  { %386 = vsyncpa [#allocation3], 1 }
 0x15b   :  { %387 = vsyncpa [#allocation4], 1 }

</bundles_post_ra>
